<compile_context>
chip_gen: v5e
topology: v5e:2x2
jax: 0.10.0
libtpu: 0.0.40
codegen_flags: <defaults>
</compile_context>

<pallas_src>
import jax
import jax.numpy as jnp
from jax.experimental import pallas as pl
from jax.experimental.pallas import tpu as pltpu

# (fan_in, fan_out) per layer — matches torch Linear(8,6), (6,4), (4,2), (2,1).
_DIMS = ((8, 6), (6, 4), (4, 2), (2, 1))
_N_PARAMS = sum(fo * (fi + 1) for fi, fo in _DIMS)  # 95 scalars total


def _mlp_kernel(theta_ref, x_ref, o_ref):
    """theta_ref: SMEM (95,) f32 scalar table.
       x_ref:     VMEM (8, batch_tile)  -- batch on lanes.
       o_ref:     VMEM (1, batch_tile)."""
    # Input activations as lane-dense [1, batch_tile] rows (one per feature).
    rows = [x_ref[pl.ds(k, 1), :] for k in range(_DIMS[0][0])]

    idx = 0  # static cursor into the packed scalar table
    for fan_in, fan_out in _DIMS:
        new_rows = []
        for _o in range(fan_out):
            # Unrolled broadcast-FMA: sum_k w[o,k] * h[k, :]  (all on the VPU).
            acc = theta_ref[idx] * rows[0]
            idx += 1
            for k in range(1, fan_in):
                acc = acc + theta_ref[idx] * rows[k]
                idx += 1
            acc = acc + theta_ref[idx]  # bias (scalar broadcast)
            idx += 1
            # sigmoid(x) = 1 / (1 + exp(-x)); exp + approx reciprocal stay on the EUP.
            new_rows.append(pl.reciprocal(1.0 + jnp.exp(-acc), approx=True))
        rows = new_rows

    o_ref[...] = rows[0]  # final layer has a single [1, batch_tile] row


def pack_params(params):
    """Flatten weights+biases into one f32 table in the exact order the kernel reads them:
       per layer, per output unit: [w[0,o], ..., w[fan_in-1,o], b[o]]."""
    chunks = []
    for layer, (fan_in, fan_out) in enumerate(_DIMS, start=1):
        w = params[f"w{layer}"]  # (fan_in, fan_out)  (transposed vs torch)
        b = params[f"b{layer}"]  # (1, fan_out)
        for o in range(fan_out):
            chunks.append(w[:, o])
            chunks.append(b[:, o])
    theta = jnp.concatenate(chunks).astype(jnp.float32)
    assert theta.shape == (_N_PARAMS,)
    return theta


def _pick_batch_tile(B, target=8192):
    """Lane-aligned batch tile that divides B; prefer >=2 grid steps for pipelining/megacore."""
    if B % 256 != 0:
        return B  # single full tile (last dim == full array) is always legal
    t = min(target, B // 2)
    t = (t // 128) * 128
    while t >= 128 and B % t != 0:
        t -= 128
    return t if t >= 128 else B


def logistic_regression_forward(x, params, *, batch_tile=None):
    """x: [B, 8] float32 (torch layout). Returns [B, 1] float32."""
    B, F = x.shape
    assert F == _DIMS[0][0]
    if batch_tile is None:
        batch_tile = _pick_batch_tile(B)
    assert B % batch_tile == 0, "batch_tile must divide B"
    assert batch_tile == B or batch_tile % 128 == 0, \
        "batch_tile must be a multiple of 128 (lane axis) or equal to B"
    grid = (B // batch_tile,)

    theta = pack_params(params)          # (95,) f32 scalar table -> SMEM
    x_t = x.T                            # [8, B]: batch on the lane axis

    out_t = pl.pallas_call(
        _mlp_kernel,
        out_shape=jax.ShapeDtypeStruct((1, B), jnp.float32),
        grid=grid,
        in_specs=[
            # Packed scalar table: whole array in SMEM, no per-step tiling/DMA churn.
            pl.BlockSpec(memory_space=pltpu.MemorySpace.SMEM),
            # x tile: [8, batch_tile], batch (lane) axis tiled over the grid.
            pl.BlockSpec((F, batch_tile), lambda i: (0, i)),
        ],
        out_specs=pl.BlockSpec((1, batch_tile), lambda i: (0, i)),
        compiler_params=pltpu.CompilerParams(
            dimension_semantics=("parallel",)),
    )(theta, x_t)

    return out_t.reshape(B, 1)


def init_params(key):
    """Deterministic init mirroring torch.nn.Linear (U(-1/sqrt(fan_in), 1/sqrt(fan_in))).
       Weights stored as (in, out) so forward is h @ W + b."""
    params = {}
    for idx, (fan_in, fan_out) in enumerate(_DIMS, start=1):
        key, kw, kb = jax.random.split(key, 3)
        bound = 1.0 / jnp.sqrt(float(fan_in))
        params[f"w{idx}"] = jax.random.uniform(
            kw, (fan_in, fan_out), jnp.float32, minval=-bound, maxval=bound)
        params[f"b{idx}"] = jax.random.uniform(
            kb, (1, fan_out), jnp.float32, minval=-bound, maxval=bound)
    return params


def _reference_forward(x, p):
    h = x
    for i in range(1, 5):
        h = jax.nn.sigmoid(h @ p[f"w{i}"] + p[f"b{i}"])
    return h


if __name__ == "__main__":
    key = jax.random.PRNGKey(0)
    key, kx = jax.random.split(key)
    B = 256  # small demo batch; default tiling gives batch_tile=128 -> grid=(2,)
    x = jax.random.normal(kx, (B, 8), jnp.float32)
    params = init_params(key)

    out = logistic_regression_forward(x, params)
    out = jax.block_until_ready(out)

    ref = _reference_forward(x, params)
    assert out.shape == (B, 1)
    # Slightly loose tolerance: pl.reciprocal(approx=True) is an EUP approximate reciprocal.
    assert jnp.allclose(out, ref, atol=1e-3, rtol=1e-3), \
        f"max abs err {jnp.max(jnp.abs(out - ref))}"
    print("KERNEL_OK")
</pallas_src>

<mosaic_0001>
module attributes {stable_mosaic.version = 11 : i64} {
  func.func @_mlp_kernel(%arg0: i32, %arg1: memref<95xf32, #tpu.memory_space<smem>>, %arg2: memref<8x128xf32, #tpu.memory_space<vmem>>, %arg3: memref<1x128xf32, #tpu.memory_space<vmem>>) attributes {dimension_semantics = [#tpu.dimension_semantics<parallel>], iteration_bounds = array<i64: 2>, scalar_prefetch = 0 : i64, scratch_operands = 0 : i64, tpu.core_type = #tpu.core_type<tc>, window_params = [{transform_indices = @transform_0, window_bounds = array<i64: 95>}, {transform_indices = @transform_1, window_bounds = array<i64: 8, 128>}, {transform_indices = @transform_2, window_bounds = array<i64: 1, 128>}]} {
    %c0 = arith.constant 0 : index
    %c0_0 = arith.constant 0 : index
    %0 = vector.load %arg2[%c0, %c0_0] : memref<8x128xf32, #tpu.memory_space<vmem>>, vector<1x128xf32>
    %c1 = arith.constant 1 : index
    %c0_1 = arith.constant 0 : index
    %1 = vector.load %arg2[%c1, %c0_1] : memref<8x128xf32, #tpu.memory_space<vmem>>, vector<1x128xf32>
    %c2 = arith.constant 2 : index
    %c0_2 = arith.constant 0 : index
    %2 = vector.load %arg2[%c2, %c0_2] : memref<8x128xf32, #tpu.memory_space<vmem>>, vector<1x128xf32>
    %c3 = arith.constant 3 : index
    %c0_3 = arith.constant 0 : index
    %3 = vector.load %arg2[%c3, %c0_3] : memref<8x128xf32, #tpu.memory_space<vmem>>, vector<1x128xf32>
    %c4 = arith.constant 4 : index
    %c0_4 = arith.constant 0 : index
    %4 = vector.load %arg2[%c4, %c0_4] : memref<8x128xf32, #tpu.memory_space<vmem>>, vector<1x128xf32>
    %c5 = arith.constant 5 : index
    %c0_5 = arith.constant 0 : index
    %5 = vector.load %arg2[%c5, %c0_5] : memref<8x128xf32, #tpu.memory_space<vmem>>, vector<1x128xf32>
    %c6 = arith.constant 6 : index
    %c0_6 = arith.constant 0 : index
    %6 = vector.load %arg2[%c6, %c0_6] : memref<8x128xf32, #tpu.memory_space<vmem>>, vector<1x128xf32>
    %c7 = arith.constant 7 : index
    %c0_7 = arith.constant 0 : index
    %7 = vector.load %arg2[%c7, %c0_7] : memref<8x128xf32, #tpu.memory_space<vmem>>, vector<1x128xf32>
    %c0_8 = arith.constant 0 : index
    %8 = memref.load %arg1[%c0_8] : memref<95xf32, #tpu.memory_space<smem>>
    %9 = vector.broadcast %8 : f32 to vector<1x128xf32>
    %10 = arith.mulf %9, %0 : vector<1x128xf32>
    %c1_9 = arith.constant 1 : index
    %11 = memref.load %arg1[%c1_9] : memref<95xf32, #tpu.memory_space<smem>>
    %12 = vector.broadcast %11 : f32 to vector<1x128xf32>
    %13 = arith.mulf %12, %1 : vector<1x128xf32>
    %14 = arith.addf %10, %13 : vector<1x128xf32>
    %c2_10 = arith.constant 2 : index
    %15 = memref.load %arg1[%c2_10] : memref<95xf32, #tpu.memory_space<smem>>
    %16 = vector.broadcast %15 : f32 to vector<1x128xf32>
    %17 = arith.mulf %16, %2 : vector<1x128xf32>
    %18 = arith.addf %14, %17 : vector<1x128xf32>
    %c3_11 = arith.constant 3 : index
    %19 = memref.load %arg1[%c3_11] : memref<95xf32, #tpu.memory_space<smem>>
    %20 = vector.broadcast %19 : f32 to vector<1x128xf32>
    %21 = arith.mulf %20, %3 : vector<1x128xf32>
    %22 = arith.addf %18, %21 : vector<1x128xf32>
    %c4_12 = arith.constant 4 : index
    %23 = memref.load %arg1[%c4_12] : memref<95xf32, #tpu.memory_space<smem>>
    %24 = vector.broadcast %23 : f32 to vector<1x128xf32>
    %25 = arith.mulf %24, %4 : vector<1x128xf32>
    %26 = arith.addf %22, %25 : vector<1x128xf32>
    %c5_13 = arith.constant 5 : index
    %27 = memref.load %arg1[%c5_13] : memref<95xf32, #tpu.memory_space<smem>>
    %28 = vector.broadcast %27 : f32 to vector<1x128xf32>
    %29 = arith.mulf %28, %5 : vector<1x128xf32>
    %30 = arith.addf %26, %29 : vector<1x128xf32>
    %c6_14 = arith.constant 6 : index
    %31 = memref.load %arg1[%c6_14] : memref<95xf32, #tpu.memory_space<smem>>
    %32 = vector.broadcast %31 : f32 to vector<1x128xf32>
    %33 = arith.mulf %32, %6 : vector<1x128xf32>
    %34 = arith.addf %30, %33 : vector<1x128xf32>
    %c7_15 = arith.constant 7 : index
    %35 = memref.load %arg1[%c7_15] : memref<95xf32, #tpu.memory_space<smem>>
    %36 = vector.broadcast %35 : f32 to vector<1x128xf32>
    %37 = arith.mulf %36, %7 : vector<1x128xf32>
    %38 = arith.addf %34, %37 : vector<1x128xf32>
    %c8 = arith.constant 8 : index
    %39 = memref.load %arg1[%c8] : memref<95xf32, #tpu.memory_space<smem>>
    %40 = vector.broadcast %39 : f32 to vector<1x128xf32>
    %41 = arith.addf %38, %40 : vector<1x128xf32>
    %cst = arith.constant 0.000000e+00 : f32
    %42 = vector.broadcast %cst : f32 to vector<1x128xf32>
    %43 = arith.subf %42, %41 : vector<1x128xf32>
    %44 = math.exp %43 : vector<1x128xf32>
    %cst_16 = arith.constant 1.000000e+00 : f32
    %45 = vector.broadcast %cst_16 : f32 to vector<1x128xf32>
    %46 = arith.addf %45, %44 : vector<1x128xf32>
    %47 = tpu.reciprocal %46 {approx = true} : vector<1x128xf32> -> vector<1x128xf32>
    %c9 = arith.constant 9 : index
    %48 = memref.load %arg1[%c9] : memref<95xf32, #tpu.memory_space<smem>>
    %49 = vector.broadcast %48 : f32 to vector<1x128xf32>
    %50 = arith.mulf %49, %0 : vector<1x128xf32>
    %c10 = arith.constant 10 : index
    %51 = memref.load %arg1[%c10] : memref<95xf32, #tpu.memory_space<smem>>
    %52 = vector.broadcast %51 : f32 to vector<1x128xf32>
    %53 = arith.mulf %52, %1 : vector<1x128xf32>
    %54 = arith.addf %50, %53 : vector<1x128xf32>
    %c11 = arith.constant 11 : index
    %55 = memref.load %arg1[%c11] : memref<95xf32, #tpu.memory_space<smem>>
    %56 = vector.broadcast %55 : f32 to vector<1x128xf32>
    %57 = arith.mulf %56, %2 : vector<1x128xf32>
    %58 = arith.addf %54, %57 : vector<1x128xf32>
    %c12 = arith.constant 12 : index
    %59 = memref.load %arg1[%c12] : memref<95xf32, #tpu.memory_space<smem>>
    %60 = vector.broadcast %59 : f32 to vector<1x128xf32>
    %61 = arith.mulf %60, %3 : vector<1x128xf32>
    %62 = arith.addf %58, %61 : vector<1x128xf32>
    %c13 = arith.constant 13 : index
    %63 = memref.load %arg1[%c13] : memref<95xf32, #tpu.memory_space<smem>>
    %64 = vector.broadcast %63 : f32 to vector<1x128xf32>
    %65 = arith.mulf %64, %4 : vector<1x128xf32>
    %66 = arith.addf %62, %65 : vector<1x128xf32>
    %c14 = arith.constant 14 : index
    %67 = memref.load %arg1[%c14] : memref<95xf32, #tpu.memory_space<smem>>
    %68 = vector.broadcast %67 : f32 to vector<1x128xf32>
    %69 = arith.mulf %68, %5 : vector<1x128xf32>
    %70 = arith.addf %66, %69 : vector<1x128xf32>
    %c15 = arith.constant 15 : index
    %71 = memref.load %arg1[%c15] : memref<95xf32, #tpu.memory_space<smem>>
    %72 = vector.broadcast %71 : f32 to vector<1x128xf32>
    %73 = arith.mulf %72, %6 : vector<1x128xf32>
    %74 = arith.addf %70, %73 : vector<1x128xf32>
    %c16 = arith.constant 16 : index
    %75 = memref.load %arg1[%c16] : memref<95xf32, #tpu.memory_space<smem>>
    %76 = vector.broadcast %75 : f32 to vector<1x128xf32>
    %77 = arith.mulf %76, %7 : vector<1x128xf32>
    %78 = arith.addf %74, %77 : vector<1x128xf32>
    %c17 = arith.constant 17 : index
    %79 = memref.load %arg1[%c17] : memref<95xf32, #tpu.memory_space<smem>>
    %80 = vector.broadcast %79 : f32 to vector<1x128xf32>
    %81 = arith.addf %78, %80 : vector<1x128xf32>
    %cst_17 = arith.constant 0.000000e+00 : f32
    %82 = vector.broadcast %cst_17 : f32 to vector<1x128xf32>
    %83 = arith.subf %82, %81 : vector<1x128xf32>
    %84 = math.exp %83 : vector<1x128xf32>
    %cst_18 = arith.constant 1.000000e+00 : f32
    %85 = vector.broadcast %cst_18 : f32 to vector<1x128xf32>
    %86 = arith.addf %85, %84 : vector<1x128xf32>
    %87 = tpu.reciprocal %86 {approx = true} : vector<1x128xf32> -> vector<1x128xf32>
    %c18 = arith.constant 18 : index
    %88 = memref.load %arg1[%c18] : memref<95xf32, #tpu.memory_space<smem>>
    %89 = vector.broadcast %88 : f32 to vector<1x128xf32>
    %90 = arith.mulf %89, %0 : vector<1x128xf32>
    %c19 = arith.constant 19 : index
    %91 = memref.load %arg1[%c19] : memref<95xf32, #tpu.memory_space<smem>>
    %92 = vector.broadcast %91 : f32 to vector<1x128xf32>
    %93 = arith.mulf %92, %1 : vector<1x128xf32>
    %94 = arith.addf %90, %93 : vector<1x128xf32>
    %c20 = arith.constant 20 : index
    %95 = memref.load %arg1[%c20] : memref<95xf32, #tpu.memory_space<smem>>
    %96 = vector.broadcast %95 : f32 to vector<1x128xf32>
    %97 = arith.mulf %96, %2 : vector<1x128xf32>
    %98 = arith.addf %94, %97 : vector<1x128xf32>
    %c21 = arith.constant 21 : index
    %99 = memref.load %arg1[%c21] : memref<95xf32, #tpu.memory_space<smem>>
    %100 = vector.broadcast %99 : f32 to vector<1x128xf32>
    %101 = arith.mulf %100, %3 : vector<1x128xf32>
    %102 = arith.addf %98, %101 : vector<1x128xf32>
    %c22 = arith.constant 22 : index
    %103 = memref.load %arg1[%c22] : memref<95xf32, #tpu.memory_space<smem>>
    %104 = vector.broadcast %103 : f32 to vector<1x128xf32>
    %105 = arith.mulf %104, %4 : vector<1x128xf32>
    %106 = arith.addf %102, %105 : vector<1x128xf32>
    %c23 = arith.constant 23 : index
    %107 = memref.load %arg1[%c23] : memref<95xf32, #tpu.memory_space<smem>>
    %108 = vector.broadcast %107 : f32 to vector<1x128xf32>
    %109 = arith.mulf %108, %5 : vector<1x128xf32>
    %110 = arith.addf %106, %109 : vector<1x128xf32>
    %c24 = arith.constant 24 : index
    %111 = memref.load %arg1[%c24] : memref<95xf32, #tpu.memory_space<smem>>
    %112 = vector.broadcast %111 : f32 to vector<1x128xf32>
    %113 = arith.mulf %112, %6 : vector<1x128xf32>
    %114 = arith.addf %110, %113 : vector<1x128xf32>
    %c25 = arith.constant 25 : index
    %115 = memref.load %arg1[%c25] : memref<95xf32, #tpu.memory_space<smem>>
    %116 = vector.broadcast %115 : f32 to vector<1x128xf32>
    %117 = arith.mulf %116, %7 : vector<1x128xf32>
    %118 = arith.addf %114, %117 : vector<1x128xf32>
    %c26 = arith.constant 26 : index
    %119 = memref.load %arg1[%c26] : memref<95xf32, #tpu.memory_space<smem>>
    %120 = vector.broadcast %119 : f32 to vector<1x128xf32>
    %121 = arith.addf %118, %120 : vector<1x128xf32>
    %cst_19 = arith.constant 0.000000e+00 : f32
    %122 = vector.broadcast %cst_19 : f32 to vector<1x128xf32>
    %123 = arith.subf %122, %121 : vector<1x128xf32>
    %124 = math.exp %123 : vector<1x128xf32>
    %cst_20 = arith.constant 1.000000e+00 : f32
    %125 = vector.broadcast %cst_20 : f32 to vector<1x128xf32>
    %126 = arith.addf %125, %124 : vector<1x128xf32>
    %127 = tpu.reciprocal %126 {approx = true} : vector<1x128xf32> -> vector<1x128xf32>
    %c27 = arith.constant 27 : index
    %128 = memref.load %arg1[%c27] : memref<95xf32, #tpu.memory_space<smem>>
    %129 = vector.broadcast %128 : f32 to vector<1x128xf32>
    %130 = arith.mulf %129, %0 : vector<1x128xf32>
    %c28 = arith.constant 28 : index
    %131 = memref.load %arg1[%c28] : memref<95xf32, #tpu.memory_space<smem>>
    %132 = vector.broadcast %131 : f32 to vector<1x128xf32>
    %133 = arith.mulf %132, %1 : vector<1x128xf32>
    %134 = arith.addf %130, %133 : vector<1x128xf32>
    %c29 = arith.constant 29 : index
    %135 = memref.load %arg1[%c29] : memref<95xf32, #tpu.memory_space<smem>>
    %136 = vector.broadcast %135 : f32 to vector<1x128xf32>
    %137 = arith.mulf %136, %2 : vector<1x128xf32>
    %138 = arith.addf %134, %137 : vector<1x128xf32>
    %c30 = arith.constant 30 : index
    %139 = memref.load %arg1[%c30] : memref<95xf32, #tpu.memory_space<smem>>
    %140 = vector.broadcast %139 : f32 to vector<1x128xf32>
    %141 = arith.mulf %140, %3 : vector<1x128xf32>
    %142 = arith.addf %138, %141 : vector<1x128xf32>
    %c31 = arith.constant 31 : index
    %143 = memref.load %arg1[%c31] : memref<95xf32, #tpu.memory_space<smem>>
    %144 = vector.broadcast %143 : f32 to vector<1x128xf32>
    %145 = arith.mulf %144, %4 : vector<1x128xf32>
    %146 = arith.addf %142, %145 : vector<1x128xf32>
    %c32 = arith.constant 32 : index
    %147 = memref.load %arg1[%c32] : memref<95xf32, #tpu.memory_space<smem>>
    %148 = vector.broadcast %147 : f32 to vector<1x128xf32>
    %149 = arith.mulf %148, %5 : vector<1x128xf32>
    %150 = arith.addf %146, %149 : vector<1x128xf32>
    %c33 = arith.constant 33 : index
    %151 = memref.load %arg1[%c33] : memref<95xf32, #tpu.memory_space<smem>>
    %152 = vector.broadcast %151 : f32 to vector<1x128xf32>
    %153 = arith.mulf %152, %6 : vector<1x128xf32>
    %154 = arith.addf %150, %153 : vector<1x128xf32>
    %c34 = arith.constant 34 : index
    %155 = memref.load %arg1[%c34] : memref<95xf32, #tpu.memory_space<smem>>
    %156 = vector.broadcast %155 : f32 to vector<1x128xf32>
    %157 = arith.mulf %156, %7 : vector<1x128xf32>
    %158 = arith.addf %154, %157 : vector<1x128xf32>
    %c35 = arith.constant 35 : index
    %159 = memref.load %arg1[%c35] : memref<95xf32, #tpu.memory_space<smem>>
    %160 = vector.broadcast %159 : f32 to vector<1x128xf32>
    %161 = arith.addf %158, %160 : vector<1x128xf32>
    %cst_21 = arith.constant 0.000000e+00 : f32
    %162 = vector.broadcast %cst_21 : f32 to vector<1x128xf32>
    %163 = arith.subf %162, %161 : vector<1x128xf32>
    %164 = math.exp %163 : vector<1x128xf32>
    %cst_22 = arith.constant 1.000000e+00 : f32
    %165 = vector.broadcast %cst_22 : f32 to vector<1x128xf32>
    %166 = arith.addf %165, %164 : vector<1x128xf32>
    %167 = tpu.reciprocal %166 {approx = true} : vector<1x128xf32> -> vector<1x128xf32>
    %c36 = arith.constant 36 : index
    %168 = memref.load %arg1[%c36] : memref<95xf32, #tpu.memory_space<smem>>
    %169 = vector.broadcast %168 : f32 to vector<1x128xf32>
    %170 = arith.mulf %169, %0 : vector<1x128xf32>
    %c37 = arith.constant 37 : index
    %171 = memref.load %arg1[%c37] : memref<95xf32, #tpu.memory_space<smem>>
    %172 = vector.broadcast %171 : f32 to vector<1x128xf32>
    %173 = arith.mulf %172, %1 : vector<1x128xf32>
    %174 = arith.addf %170, %173 : vector<1x128xf32>
    %c38 = arith.constant 38 : index
    %175 = memref.load %arg1[%c38] : memref<95xf32, #tpu.memory_space<smem>>
    %176 = vector.broadcast %175 : f32 to vector<1x128xf32>
    %177 = arith.mulf %176, %2 : vector<1x128xf32>
    %178 = arith.addf %174, %177 : vector<1x128xf32>
    %c39 = arith.constant 39 : index
    %179 = memref.load %arg1[%c39] : memref<95xf32, #tpu.memory_space<smem>>
    %180 = vector.broadcast %179 : f32 to vector<1x128xf32>
    %181 = arith.mulf %180, %3 : vector<1x128xf32>
    %182 = arith.addf %178, %181 : vector<1x128xf32>
    %c40 = arith.constant 40 : index
    %183 = memref.load %arg1[%c40] : memref<95xf32, #tpu.memory_space<smem>>
    %184 = vector.broadcast %183 : f32 to vector<1x128xf32>
    %185 = arith.mulf %184, %4 : vector<1x128xf32>
    %186 = arith.addf %182, %185 : vector<1x128xf32>
    %c41 = arith.constant 41 : index
    %187 = memref.load %arg1[%c41] : memref<95xf32, #tpu.memory_space<smem>>
    %188 = vector.broadcast %187 : f32 to vector<1x128xf32>
    %189 = arith.mulf %188, %5 : vector<1x128xf32>
    %190 = arith.addf %186, %189 : vector<1x128xf32>
    %c42 = arith.constant 42 : index
    %191 = memref.load %arg1[%c42] : memref<95xf32, #tpu.memory_space<smem>>
    %192 = vector.broadcast %191 : f32 to vector<1x128xf32>
    %193 = arith.mulf %192, %6 : vector<1x128xf32>
    %194 = arith.addf %190, %193 : vector<1x128xf32>
    %c43 = arith.constant 43 : index
    %195 = memref.load %arg1[%c43] : memref<95xf32, #tpu.memory_space<smem>>
    %196 = vector.broadcast %195 : f32 to vector<1x128xf32>
    %197 = arith.mulf %196, %7 : vector<1x128xf32>
    %198 = arith.addf %194, %197 : vector<1x128xf32>
    %c44 = arith.constant 44 : index
    %199 = memref.load %arg1[%c44] : memref<95xf32, #tpu.memory_space<smem>>
    %200 = vector.broadcast %199 : f32 to vector<1x128xf32>
    %201 = arith.addf %198, %200 : vector<1x128xf32>
    %cst_23 = arith.constant 0.000000e+00 : f32
    %202 = vector.broadcast %cst_23 : f32 to vector<1x128xf32>
    %203 = arith.subf %202, %201 : vector<1x128xf32>
    %204 = math.exp %203 : vector<1x128xf32>
    %cst_24 = arith.constant 1.000000e+00 : f32
    %205 = vector.broadcast %cst_24 : f32 to vector<1x128xf32>
    %206 = arith.addf %205, %204 : vector<1x128xf32>
    %207 = tpu.reciprocal %206 {approx = true} : vector<1x128xf32> -> vector<1x128xf32>
    %c45 = arith.constant 45 : index
    %208 = memref.load %arg1[%c45] : memref<95xf32, #tpu.memory_space<smem>>
    %209 = vector.broadcast %208 : f32 to vector<1x128xf32>
    %210 = arith.mulf %209, %0 : vector<1x128xf32>
    %c46 = arith.constant 46 : index
    %211 = memref.load %arg1[%c46] : memref<95xf32, #tpu.memory_space<smem>>
    %212 = vector.broadcast %211 : f32 to vector<1x128xf32>
    %213 = arith.mulf %212, %1 : vector<1x128xf32>
    %214 = arith.addf %210, %213 : vector<1x128xf32>
    %c47 = arith.constant 47 : index
    %215 = memref.load %arg1[%c47] : memref<95xf32, #tpu.memory_space<smem>>
    %216 = vector.broadcast %215 : f32 to vector<1x128xf32>
    %217 = arith.mulf %216, %2 : vector<1x128xf32>
    %218 = arith.addf %214, %217 : vector<1x128xf32>
    %c48 = arith.constant 48 : index
    %219 = memref.load %arg1[%c48] : memref<95xf32, #tpu.memory_space<smem>>
    %220 = vector.broadcast %219 : f32 to vector<1x128xf32>
    %221 = arith.mulf %220, %3 : vector<1x128xf32>
    %222 = arith.addf %218, %221 : vector<1x128xf32>
    %c49 = arith.constant 49 : index
    %223 = memref.load %arg1[%c49] : memref<95xf32, #tpu.memory_space<smem>>
    %224 = vector.broadcast %223 : f32 to vector<1x128xf32>
    %225 = arith.mulf %224, %4 : vector<1x128xf32>
    %226 = arith.addf %222, %225 : vector<1x128xf32>
    %c50 = arith.constant 50 : index
    %227 = memref.load %arg1[%c50] : memref<95xf32, #tpu.memory_space<smem>>
    %228 = vector.broadcast %227 : f32 to vector<1x128xf32>
    %229 = arith.mulf %228, %5 : vector<1x128xf32>
    %230 = arith.addf %226, %229 : vector<1x128xf32>
    %c51 = arith.constant 51 : index
    %231 = memref.load %arg1[%c51] : memref<95xf32, #tpu.memory_space<smem>>
    %232 = vector.broadcast %231 : f32 to vector<1x128xf32>
    %233 = arith.mulf %232, %6 : vector<1x128xf32>
    %234 = arith.addf %230, %233 : vector<1x128xf32>
    %c52 = arith.constant 52 : index
    %235 = memref.load %arg1[%c52] : memref<95xf32, #tpu.memory_space<smem>>
    %236 = vector.broadcast %235 : f32 to vector<1x128xf32>
    %237 = arith.mulf %236, %7 : vector<1x128xf32>
    %238 = arith.addf %234, %237 : vector<1x128xf32>
    %c53 = arith.constant 53 : index
    %239 = memref.load %arg1[%c53] : memref<95xf32, #tpu.memory_space<smem>>
    %240 = vector.broadcast %239 : f32 to vector<1x128xf32>
    %241 = arith.addf %238, %240 : vector<1x128xf32>
    %cst_25 = arith.constant 0.000000e+00 : f32
    %242 = vector.broadcast %cst_25 : f32 to vector<1x128xf32>
    %243 = arith.subf %242, %241 : vector<1x128xf32>
    %244 = math.exp %243 : vector<1x128xf32>
    %cst_26 = arith.constant 1.000000e+00 : f32
    %245 = vector.broadcast %cst_26 : f32 to vector<1x128xf32>
    %246 = arith.addf %245, %244 : vector<1x128xf32>
    %247 = tpu.reciprocal %246 {approx = true} : vector<1x128xf32> -> vector<1x128xf32>
    %c54 = arith.constant 54 : index
    %248 = memref.load %arg1[%c54] : memref<95xf32, #tpu.memory_space<smem>>
    %249 = vector.broadcast %248 : f32 to vector<1x128xf32>
    %250 = arith.mulf %249, %47 : vector<1x128xf32>
    %c55 = arith.constant 55 : index
    %251 = memref.load %arg1[%c55] : memref<95xf32, #tpu.memory_space<smem>>
    %252 = vector.broadcast %251 : f32 to vector<1x128xf32>
    %253 = arith.mulf %252, %87 : vector<1x128xf32>
    %254 = arith.addf %250, %253 : vector<1x128xf32>
    %c56 = arith.constant 56 : index
    %255 = memref.load %arg1[%c56] : memref<95xf32, #tpu.memory_space<smem>>
    %256 = vector.broadcast %255 : f32 to vector<1x128xf32>
    %257 = arith.mulf %256, %127 : vector<1x128xf32>
    %258 = arith.addf %254, %257 : vector<1x128xf32>
    %c57 = arith.constant 57 : index
    %259 = memref.load %arg1[%c57] : memref<95xf32, #tpu.memory_space<smem>>
    %260 = vector.broadcast %259 : f32 to vector<1x128xf32>
    %261 = arith.mulf %260, %167 : vector<1x128xf32>
    %262 = arith.addf %258, %261 : vector<1x128xf32>
    %c58 = arith.constant 58 : index
    %263 = memref.load %arg1[%c58] : memref<95xf32, #tpu.memory_space<smem>>
    %264 = vector.broadcast %263 : f32 to vector<1x128xf32>
    %265 = arith.mulf %264, %207 : vector<1x128xf32>
    %266 = arith.addf %262, %265 : vector<1x128xf32>
    %c59 = arith.constant 59 : index
    %267 = memref.load %arg1[%c59] : memref<95xf32, #tpu.memory_space<smem>>
    %268 = vector.broadcast %267 : f32 to vector<1x128xf32>
    %269 = arith.mulf %268, %247 : vector<1x128xf32>
    %270 = arith.addf %266, %269 : vector<1x128xf32>
    %c60 = arith.constant 60 : index
    %271 = memref.load %arg1[%c60] : memref<95xf32, #tpu.memory_space<smem>>
    %272 = vector.broadcast %271 : f32 to vector<1x128xf32>
    %273 = arith.addf %270, %272 : vector<1x128xf32>
    %cst_27 = arith.constant 0.000000e+00 : f32
    %274 = vector.broadcast %cst_27 : f32 to vector<1x128xf32>
    %275 = arith.subf %274, %273 : vector<1x128xf32>
    %276 = math.exp %275 : vector<1x128xf32>
    %cst_28 = arith.constant 1.000000e+00 : f32
    %277 = vector.broadcast %cst_28 : f32 to vector<1x128xf32>
    %278 = arith.addf %277, %276 : vector<1x128xf32>
    %279 = tpu.reciprocal %278 {approx = true} : vector<1x128xf32> -> vector<1x128xf32>
    %c61 = arith.constant 61 : index
    %280 = memref.load %arg1[%c61] : memref<95xf32, #tpu.memory_space<smem>>
    %281 = vector.broadcast %280 : f32 to vector<1x128xf32>
    %282 = arith.mulf %281, %47 : vector<1x128xf32>
    %c62 = arith.constant 62 : index
    %283 = memref.load %arg1[%c62] : memref<95xf32, #tpu.memory_space<smem>>
    %284 = vector.broadcast %283 : f32 to vector<1x128xf32>
    %285 = arith.mulf %284, %87 : vector<1x128xf32>
    %286 = arith.addf %282, %285 : vector<1x128xf32>
    %c63 = arith.constant 63 : index
    %287 = memref.load %arg1[%c63] : memref<95xf32, #tpu.memory_space<smem>>
    %288 = vector.broadcast %287 : f32 to vector<1x128xf32>
    %289 = arith.mulf %288, %127 : vector<1x128xf32>
    %290 = arith.addf %286, %289 : vector<1x128xf32>
    %c64 = arith.constant 64 : index
    %291 = memref.load %arg1[%c64] : memref<95xf32, #tpu.memory_space<smem>>
    %292 = vector.broadcast %291 : f32 to vector<1x128xf32>
    %293 = arith.mulf %292, %167 : vector<1x128xf32>
    %294 = arith.addf %290, %293 : vector<1x128xf32>
    %c65 = arith.constant 65 : index
    %295 = memref.load %arg1[%c65] : memref<95xf32, #tpu.memory_space<smem>>
    %296 = vector.broadcast %295 : f32 to vector<1x128xf32>
    %297 = arith.mulf %296, %207 : vector<1x128xf32>
    %298 = arith.addf %294, %297 : vector<1x128xf32>
    %c66 = arith.constant 66 : index
    %299 = memref.load %arg1[%c66] : memref<95xf32, #tpu.memory_space<smem>>
    %300 = vector.broadcast %299 : f32 to vector<1x128xf32>
    %301 = arith.mulf %300, %247 : vector<1x128xf32>
    %302 = arith.addf %298, %301 : vector<1x128xf32>
    %c67 = arith.constant 67 : index
    %303 = memref.load %arg1[%c67] : memref<95xf32, #tpu.memory_space<smem>>
    %304 = vector.broadcast %303 : f32 to vector<1x128xf32>
    %305 = arith.addf %302, %304 : vector<1x128xf32>
    %cst_29 = arith.constant 0.000000e+00 : f32
    %306 = vector.broadcast %cst_29 : f32 to vector<1x128xf32>
    %307 = arith.subf %306, %305 : vector<1x128xf32>
    %308 = math.exp %307 : vector<1x128xf32>
    %cst_30 = arith.constant 1.000000e+00 : f32
    %309 = vector.broadcast %cst_30 : f32 to vector<1x128xf32>
    %310 = arith.addf %309, %308 : vector<1x128xf32>
    %311 = tpu.reciprocal %310 {approx = true} : vector<1x128xf32> -> vector<1x128xf32>
    %c68 = arith.constant 68 : index
    %312 = memref.load %arg1[%c68] : memref<95xf32, #tpu.memory_space<smem>>
    %313 = vector.broadcast %312 : f32 to vector<1x128xf32>
    %314 = arith.mulf %313, %47 : vector<1x128xf32>
    %c69 = arith.constant 69 : index
    %315 = memref.load %arg1[%c69] : memref<95xf32, #tpu.memory_space<smem>>
    %316 = vector.broadcast %315 : f32 to vector<1x128xf32>
    %317 = arith.mulf %316, %87 : vector<1x128xf32>
    %318 = arith.addf %314, %317 : vector<1x128xf32>
    %c70 = arith.constant 70 : index
    %319 = memref.load %arg1[%c70] : memref<95xf32, #tpu.memory_space<smem>>
    %320 = vector.broadcast %319 : f32 to vector<1x128xf32>
    %321 = arith.mulf %320, %127 : vector<1x128xf32>
    %322 = arith.addf %318, %321 : vector<1x128xf32>
    %c71 = arith.constant 71 : index
    %323 = memref.load %arg1[%c71] : memref<95xf32, #tpu.memory_space<smem>>
    %324 = vector.broadcast %323 : f32 to vector<1x128xf32>
    %325 = arith.mulf %324, %167 : vector<1x128xf32>
    %326 = arith.addf %322, %325 : vector<1x128xf32>
    %c72 = arith.constant 72 : index
    %327 = memref.load %arg1[%c72] : memref<95xf32, #tpu.memory_space<smem>>
    %328 = vector.broadcast %327 : f32 to vector<1x128xf32>
    %329 = arith.mulf %328, %207 : vector<1x128xf32>
    %330 = arith.addf %326, %329 : vector<1x128xf32>
    %c73 = arith.constant 73 : index
    %331 = memref.load %arg1[%c73] : memref<95xf32, #tpu.memory_space<smem>>
    %332 = vector.broadcast %331 : f32 to vector<1x128xf32>
    %333 = arith.mulf %332, %247 : vector<1x128xf32>
    %334 = arith.addf %330, %333 : vector<1x128xf32>
    %c74 = arith.constant 74 : index
    %335 = memref.load %arg1[%c74] : memref<95xf32, #tpu.memory_space<smem>>
    %336 = vector.broadcast %335 : f32 to vector<1x128xf32>
    %337 = arith.addf %334, %336 : vector<1x128xf32>
    %cst_31 = arith.constant 0.000000e+00 : f32
    %338 = vector.broadcast %cst_31 : f32 to vector<1x128xf32>
    %339 = arith.subf %338, %337 : vector<1x128xf32>
    %340 = math.exp %339 : vector<1x128xf32>
    %cst_32 = arith.constant 1.000000e+00 : f32
    %341 = vector.broadcast %cst_32 : f32 to vector<1x128xf32>
    %342 = arith.addf %341, %340 : vector<1x128xf32>
    %343 = tpu.reciprocal %342 {approx = true} : vector<1x128xf32> -> vector<1x128xf32>
    %c75 = arith.constant 75 : index
    %344 = memref.load %arg1[%c75] : memref<95xf32, #tpu.memory_space<smem>>
    %345 = vector.broadcast %344 : f32 to vector<1x128xf32>
    %346 = arith.mulf %345, %47 : vector<1x128xf32>
    %c76 = arith.constant 76 : index
    %347 = memref.load %arg1[%c76] : memref<95xf32, #tpu.memory_space<smem>>
    %348 = vector.broadcast %347 : f32 to vector<1x128xf32>
    %349 = arith.mulf %348, %87 : vector<1x128xf32>
    %350 = arith.addf %346, %349 : vector<1x128xf32>
    %c77 = arith.constant 77 : index
    %351 = memref.load %arg1[%c77] : memref<95xf32, #tpu.memory_space<smem>>
    %352 = vector.broadcast %351 : f32 to vector<1x128xf32>
    %353 = arith.mulf %352, %127 : vector<1x128xf32>
    %354 = arith.addf %350, %353 : vector<1x128xf32>
    %c78 = arith.constant 78 : index
    %355 = memref.load %arg1[%c78] : memref<95xf32, #tpu.memory_space<smem>>
    %356 = vector.broadcast %355 : f32 to vector<1x128xf32>
    %357 = arith.mulf %356, %167 : vector<1x128xf32>
    %358 = arith.addf %354, %357 : vector<1x128xf32>
    %c79 = arith.constant 79 : index
    %359 = memref.load %arg1[%c79] : memref<95xf32, #tpu.memory_space<smem>>
    %360 = vector.broadcast %359 : f32 to vector<1x128xf32>
    %361 = arith.mulf %360, %207 : vector<1x128xf32>
    %362 = arith.addf %358, %361 : vector<1x128xf32>
    %c80 = arith.constant 80 : index
    %363 = memref.load %arg1[%c80] : memref<95xf32, #tpu.memory_space<smem>>
    %364 = vector.broadcast %363 : f32 to vector<1x128xf32>
    %365 = arith.mulf %364, %247 : vector<1x128xf32>
    %366 = arith.addf %362, %365 : vector<1x128xf32>
    %c81 = arith.constant 81 : index
    %367 = memref.load %arg1[%c81] : memref<95xf32, #tpu.memory_space<smem>>
    %368 = vector.broadcast %367 : f32 to vector<1x128xf32>
    %369 = arith.addf %366, %368 : vector<1x128xf32>
    %cst_33 = arith.constant 0.000000e+00 : f32
    %370 = vector.broadcast %cst_33 : f32 to vector<1x128xf32>
    %371 = arith.subf %370, %369 : vector<1x128xf32>
    %372 = math.exp %371 : vector<1x128xf32>
    %cst_34 = arith.constant 1.000000e+00 : f32
    %373 = vector.broadcast %cst_34 : f32 to vector<1x128xf32>
    %374 = arith.addf %373, %372 : vector<1x128xf32>
    %375 = tpu.reciprocal %374 {approx = true} : vector<1x128xf32> -> vector<1x128xf32>
    %c82 = arith.constant 82 : index
    %376 = memref.load %arg1[%c82] : memref<95xf32, #tpu.memory_space<smem>>
    %377 = vector.broadcast %376 : f32 to vector<1x128xf32>
    %378 = arith.mulf %377, %279 : vector<1x128xf32>
    %c83 = arith.constant 83 : index
    %379 = memref.load %arg1[%c83] : memref<95xf32, #tpu.memory_space<smem>>
    %380 = vector.broadcast %379 : f32 to vector<1x128xf32>
    %381 = arith.mulf %380, %311 : vector<1x128xf32>
    %382 = arith.addf %378, %381 : vector<1x128xf32>
    %c84 = arith.constant 84 : index
    %383 = memref.load %arg1[%c84] : memref<95xf32, #tpu.memory_space<smem>>
    %384 = vector.broadcast %383 : f32 to vector<1x128xf32>
    %385 = arith.mulf %384, %343 : vector<1x128xf32>
    %386 = arith.addf %382, %385 : vector<1x128xf32>
    %c85 = arith.constant 85 : index
    %387 = memref.load %arg1[%c85] : memref<95xf32, #tpu.memory_space<smem>>
    %388 = vector.broadcast %387 : f32 to vector<1x128xf32>
    %389 = arith.mulf %388, %375 : vector<1x128xf32>
    %390 = arith.addf %386, %389 : vector<1x128xf32>
    %c86 = arith.constant 86 : index
    %391 = memref.load %arg1[%c86] : memref<95xf32, #tpu.memory_space<smem>>
    %392 = vector.broadcast %391 : f32 to vector<1x128xf32>
    %393 = arith.addf %390, %392 : vector<1x128xf32>
    %cst_35 = arith.constant 0.000000e+00 : f32
    %394 = vector.broadcast %cst_35 : f32 to vector<1x128xf32>
    %395 = arith.subf %394, %393 : vector<1x128xf32>
    %396 = math.exp %395 : vector<1x128xf32>
    %cst_36 = arith.constant 1.000000e+00 : f32
    %397 = vector.broadcast %cst_36 : f32 to vector<1x128xf32>
    %398 = arith.addf %397, %396 : vector<1x128xf32>
    %399 = tpu.reciprocal %398 {approx = true} : vector<1x128xf32> -> vector<1x128xf32>
    %c87 = arith.constant 87 : index
    %400 = memref.load %arg1[%c87] : memref<95xf32, #tpu.memory_space<smem>>
    %401 = vector.broadcast %400 : f32 to vector<1x128xf32>
    %402 = arith.mulf %401, %279 : vector<1x128xf32>
    %c88 = arith.constant 88 : index
    %403 = memref.load %arg1[%c88] : memref<95xf32, #tpu.memory_space<smem>>
    %404 = vector.broadcast %403 : f32 to vector<1x128xf32>
    %405 = arith.mulf %404, %311 : vector<1x128xf32>
    %406 = arith.addf %402, %405 : vector<1x128xf32>
    %c89 = arith.constant 89 : index
    %407 = memref.load %arg1[%c89] : memref<95xf32, #tpu.memory_space<smem>>
    %408 = vector.broadcast %407 : f32 to vector<1x128xf32>
    %409 = arith.mulf %408, %343 : vector<1x128xf32>
    %410 = arith.addf %406, %409 : vector<1x128xf32>
    %c90 = arith.constant 90 : index
    %411 = memref.load %arg1[%c90] : memref<95xf32, #tpu.memory_space<smem>>
    %412 = vector.broadcast %411 : f32 to vector<1x128xf32>
    %413 = arith.mulf %412, %375 : vector<1x128xf32>
    %414 = arith.addf %410, %413 : vector<1x128xf32>
    %c91 = arith.constant 91 : index
    %415 = memref.load %arg1[%c91] : memref<95xf32, #tpu.memory_space<smem>>
    %416 = vector.broadcast %415 : f32 to vector<1x128xf32>
    %417 = arith.addf %414, %416 : vector<1x128xf32>
    %cst_37 = arith.constant 0.000000e+00 : f32
    %418 = vector.broadcast %cst_37 : f32 to vector<1x128xf32>
    %419 = arith.subf %418, %417 : vector<1x128xf32>
    %420 = math.exp %419 : vector<1x128xf32>
    %cst_38 = arith.constant 1.000000e+00 : f32
    %421 = vector.broadcast %cst_38 : f32 to vector<1x128xf32>
    %422 = arith.addf %421, %420 : vector<1x128xf32>
    %423 = tpu.reciprocal %422 {approx = true} : vector<1x128xf32> -> vector<1x128xf32>
    %c92 = arith.constant 92 : index
    %424 = memref.load %arg1[%c92] : memref<95xf32, #tpu.memory_space<smem>>
    %425 = vector.broadcast %424 : f32 to vector<1x128xf32>
    %426 = arith.mulf %425, %399 : vector<1x128xf32>
    %c93 = arith.constant 93 : index
    %427 = memref.load %arg1[%c93] : memref<95xf32, #tpu.memory_space<smem>>
    %428 = vector.broadcast %427 : f32 to vector<1x128xf32>
    %429 = arith.mulf %428, %423 : vector<1x128xf32>
    %430 = arith.addf %426, %429 : vector<1x128xf32>
    %c94 = arith.constant 94 : index
    %431 = memref.load %arg1[%c94] : memref<95xf32, #tpu.memory_space<smem>>
    %432 = vector.broadcast %431 : f32 to vector<1x128xf32>
    %433 = arith.addf %430, %432 : vector<1x128xf32>
    %cst_39 = arith.constant 0.000000e+00 : f32
    %434 = vector.broadcast %cst_39 : f32 to vector<1x128xf32>
    %435 = arith.subf %434, %433 : vector<1x128xf32>
    %436 = math.exp %435 : vector<1x128xf32>
    %cst_40 = arith.constant 1.000000e+00 : f32
    %437 = vector.broadcast %cst_40 : f32 to vector<1x128xf32>
    %438 = arith.addf %437, %436 : vector<1x128xf32>
    %439 = tpu.reciprocal %438 {approx = true} : vector<1x128xf32> -> vector<1x128xf32>
    %c0_41 = arith.constant 0 : index
    %c0_42 = arith.constant 0 : index
    %440 = vector.load %arg3[%c0_41, %c0_42] : memref<1x128xf32, #tpu.memory_space<vmem>>, vector<1x128xf32>
    tpu.vector_store %arg3[%c0_41, %c0_42], %439 {strides = array<i32>} : memref<1x128xf32, #tpu.memory_space<vmem>>, vector<1x128xf32>,
    return
  }
  func.func @transform_0(%arg0: i32) -> i32 {
    %c0_i32 = arith.constant 0 : i32
    %c0_i32_0 = arith.constant 0 : i32
    return %c0_i32 : i32
  }
  func.func @transform_1(%arg0: i32) -> (i32, i32) {
    %c0_i32 = arith.constant 0 : i32
    %c0_i32_0 = arith.constant 0 : i32
    return %c0_i32, %arg0 : i32, i32
  }
  func.func @transform_2(%arg0: i32) -> (i32, i32) {
    %c0_i32 = arith.constant 0 : i32
    %c0_i32_0 = arith.constant 0 : i32
    return %c0_i32, %arg0 : i32, i32
  }
}

</mosaic_0001>

<bundles_post_ra>
// kernel: tpu_custom_call.1
= control target key start
LH: loop header
LB: loop body
LE: loop exit
PB: predicated region body
PF: predicated region fallthrough
CT: control target
= control target key end

     0   :  { %7 = vsyncpa [#allocation5], 0  ;;  %s1445_s0 = inlined_call_operand.hbm [shape: f32[95], index: 0, kind: input, shape index: {}]   ;;  %s1446_s1 = inlined_call_operand.hbm [shape: f32[8,256], index: 1, kind: input, shape index: {}]   ;;  %s1447_s2 = inlined_call_operand.hbm [shape: f32[1,256], index: 2, kind: output, shape index: {}]  }
   0x1   :  { %8 = vsyncpa [#allocation3], 0 }
   0x2   :  { %10 = vsyncpa [#allocation3 + $0x1], 0 }
   0x3   :  { %11 = vsyncpa [#allocation4], 0 }
   0x4   :  { %13 = vsyncpa [#allocation4 + $0x1], 0  ;;  %s1040_s9 = smov 0   ;;  %s1042_s10 = smov 0  }
   0x5   :  { %s1044_s11 = smov 0   ;;  %s1046_s12 = smov 0  }
   0x6 LB: > { %s1061_s13 = sadd.s32 4294967295, %s1022_s12   ;;  %s693_s14 = sadd.s32 4294967294, %s1022_s12   ;;  %s1022_s12 = sphi %s1046_s12, %s1457_s12   ;;  %s1018_s11 = sphi %s1044_s11, %s1456_s11   ;;  %s1014_s10 = sphi %s1042_s10, %s1455_s10   ;;  %s1010_s9 = sphi %s1040_s9, %s1454_s9  }
   0x7   : > { %p60_p0 = scmp.ne.s32.totalorder %s1014_s10, %s1010_s9  ;;  %p61_p1 = scmp.eq.s32.totalorder %s1061_s13, 0 }
   0x8   : > { %p84_p2 = scmp.eq.s32.totalorder %s1061_s13, 1  ;;  %p90_p3 = scmp.eq.s32.totalorder %s693_s14, 1 }
   0x9   : > { %p1070_p4 = por %p61_p1, %p60_p0  ;;  %p694_p5 = scmp.ge.s32.totalorder %s1022_s12, 1 }
   0xa   : > { %p1075_p6 = por %p90_p3, %p60_p0  ;;  %p97_p7 = scmp.lt.s32.totalorder %s1022_s12, 3 }
   0xb   : > { %s109_s19 = sshll.u32 %s1445_s0, 4  ;;  %s1091_s21 = sadd.s32 1, %s1022_s12   ;;  %s110_s19 = int_to_ptr.hbm [resolvable:$true] %s109_s19 }
   0xc   : > { %p1083_p8 = pnand %p694_p5, %p97_p7  ;;  %s44_s22 = ssub.s32 %s1022_s12, %s1091_s21 }
   0xd   : > { %p45_p12 = scmp.eq.s32.totalorder %s44_s22, 0  ;;  %s47_s23 = sadd.s32 1, %s1018_s11 }
   0xe   : > { %p806_p10 = pneg %p1083_p8  ;;  %p54_p13 = scmp.ne.s32.totalorder %s1018_s11, %s1014_s10 }
   0xf   : > { %s1024_s24 = smov [#allocation2]   ;;  %p55_p0 = scmp.eq.s32.totalorder %s1022_s12, 0 }
  0x10   : > { %p807_p11 = pnand %p806_p10, %p61_p1  ;;  %p1106_p3 = por %p84_p2, %p54_p13 }
  0x11   : > { %s1101_s25 = scalar_select %p45_p12, %s1018_s11, %s47_s23  }
  0x12   : > { %809 = dma.hbm_to_smem (!%p807_p11), %s110_s19, 16, %s1024_s24, [#allocation5]  }
  0x13   : > { %s120_s27 = sand.u32 1, %s1018_s11   ;;  %p56_p5 = por %p55_p0, %p54_p13 }
  0x14   : > { %p819_p7 = scmp.lt.s32.totalorder %s1022_s12, 2  ;;  %s697_s28 = sshll.u32 %s120_s27, 3 }
  0x15   : > { %s698_s29 = sshll.u32 %s1022_s12, 3  ;;  %s124_s6 = scalar_lea.vmem [#allocation6], %s697_s28 }
  0x16   : > { %s128_s4 = scalar_lea.hbm %s1446_s1, %s698_s29  ;;  %s132_s7 = sshll.u32 %s124_s6, 4  ;;  %s133_s7 = int_to_ptr.vmem [resolvable:$true] %s132_s7 }
  0x17   : > { %s130_s5 = sshll.u32 %s128_s4, 4  ;;  %p1116_p10 = pnand %p819_p7, %p56_p5  ;;  %s131_s5 = int_to_ptr.hbm [resolvable:$true] %s130_s5 }
  0x18   : > { %s121_s14 = scalar_lea.sflag [#allocation3], %s120_s27  ;;  %s922_s17 = sshra.s32 %s131_s5, 4  ;;  %s923_s17 = int_to_ptr.hbm [resolvable:$true] %s922_s17 }
  0x19   : > { %s924_s18 = scalar_lea.hbm %s923_s17, 8  ;;  %p926_p11 = pneg %p1116_p10 }
  0x1a   : > { %p925_p2 = scmp.ne.s32.totalorder %s923_s17, %s924_s18  ;;  %s929_s23 = scalar_lea.hbm %s1446_s1, 16 }
  0x1b   : > { %p930_p0 = scmp.lt.s32.totalorder %s923_s17, %s1446_s1  ;;  %p931_p5 = scmp.lt.s32.totalorder %s929_s23, %s924_s18 }
  0x1c   : > { %p927_p12 = pnand %p926_p11, %p925_p2 }
  0x1d   : > { %p932_p7 = por %p931_p5, %p930_p0 }
  0x1e   : > { %p928_p13 = pneg %p927_p12 }
  0x20   : > { %p933_p9 = pnand %p932_p7, %p928_p13 }
  0x22   : > { %936 = shalt.err (!%p933_p9)
}
  0x23   : > { %813 = dma.hbm_to_vmem [thread:$0]  (!%p1116_p10), %s131_s5, 128, %s133_s7, %s121_s14  }
  0x24   : > { %141 = sbr.rel (%p1083_p8) target bundleno = 227 (0xe3), region = 28 }
  0x29   : > { %997 = dma.done.wait (%p61_p1), [#allocation5], 16  }
  0x2a   : > { %999 = vsyncadd (%p61_p1), [#allocation5], 4294967280  ;;  %s1137_s27 = sand.u32 1, %s1014_s10  }
  0x2b   : > { %s701_s29 = sshll.u32 %s1137_s27, 3  ;;  %s149_s30 = scalar_lea.sflag [#allocation3], %s1137_s27 }
  0x2c   : > { %s1141_s3 = scalar_lea.vmem [#allocation6], %s701_s29 }
  0x2d   : > { %1001 = dma.done.wait (%p1070_p4), %s149_s30, 128  }
  0x2e   : > { %1003 = vsyncadd (%p1070_p4), %s149_s30, 4294967168 }
  0x2f   : > { %158 = sfence }
  0x30   : > { %s182_s20 = sld [smem:[#allocation2]]  ;;  %v1148_v0 = vld [vmem:[%s1141_s3] sm:$0x1]  ;;  %v1151_v1 = vld [vmem:[%s1141_s3 + $0x1] sm:$0x1] }
  0x31   : > { %s702_s4 = sld [smem:[#allocation2 + $0x1]]  ;;  %v1156_v2 = vld [vmem:[%s1141_s3 + $0x2] sm:$0x1]  ;;  %v1161_v4 = vld [vmem:[%s1141_s3 + $0x3] sm:$0x1] }
  0x32   : > { %s703_s5 = sld [smem:[#allocation2 + $0x2]]  ;;  %v1170_v9 = vld [vmem:[%s1141_s3 + $0x4] sm:$0x1]  ;;  %v1176_v17 = vld [vmem:[%s1141_s3 + $0x5] sm:$0x1] }
  0x33   : > { %s704_s6 = sld [smem:[#allocation2 + $0x3]]  ;;  %v1188_v25 = vld [vmem:[%s1141_s3 + $0x6] sm:$0x1]  ;;  %v1199_v37 = vld [vmem:[%s1141_s3 + $0x7] sm:$0x1] }
  0x34   : > { %s705_s7 = sld [smem:[#allocation2 + $0x4]] }
  0x35   : > { %s1153_s8 = sld [smem:[#allocation2 + $0x5]] }
  0x36   : > { %v183_v3 = vstv %s182_s20  ;;  %s1158_s15 = sld [smem:[#allocation2 + $0x6]] }
  0x37   : > { %v184_v5 = vmul.f32 %v183_v3, %v1148_v0  ;;  %v186_v6 = vstv %s702_s4  ;;  %s1164_s14 = sld [smem:[#allocation2 + $0x7]] }
  0x38   : > { %v187_v7 = vmul.f32 %v186_v6, %v1151_v1  ;;  %v190_v8 = vstv %s703_s5  ;;  %s1167_s17 = sld [smem:[#allocation2 + $0x8]] }
  0x39   : > { %v191_v10 = vmul.f32 %v190_v8, %v1156_v2  ;;  %v194_v11 = vstv %s704_s6  ;;  %s710_s18 = sld [smem:[#allocation2 + $0x9]] }
  0x3a   : > { %v188_v12 = vadd.f32 %v187_v7, %v184_v5  ;;  %v195_v13 = vmul.f32 %v194_v11, %v1161_v4  ;;  %v198_v14 = vstv %s705_s7  ;;  %s711_s19 = sld [smem:[#allocation2 + $0xa]] }
  0x3b   : > { %s712_s22 = sld [smem:[#allocation2 + $0xb]]  ;;  %v199_v16 = vmul.f32 %v198_v14, %v1170_v9  ;;  %v202_v18 = vstv %s1153_s8 }
  0x3c   : > { %v192_v15 = vadd.f32 %v191_v10, %v188_v12  ;;  %s713_s23 = sld [smem:[#allocation2 + $0xc]]  ;;  %v203_v22 = vmul.f32 %v202_v18, %v1176_v17  ;;  %v206_v26 = vstv %s1158_s15 }
  0x3d   : > { %s714_s24 = sld [smem:[#allocation2 + $0xd]]  ;;  %v207_v35 = vmul.f32 %v206_v26, %v1188_v25  ;;  %v210_v38 = vstv %s1164_s14 }
  0x3e   : > { %v196_v19 = vadd.f32 %v195_v13, %v192_v15  ;;  %s1179_s28 = sld [smem:[#allocation2 + $0xe]]  ;;  %v211_v45 = vmul.f32 %v210_v38, %v1199_v37  ;;  %v214_v3 = vstv %s1167_s17 }
  0x3f   : > { %v222_v20 = vstv %s710_s18  ;;  %s1181_s29 = sld [smem:[#allocation2 + $0xf]] }
  0x40   : > { %v200_v21 = vadd.f32 %v199_v16, %v196_v19  ;;  %v223_v23 = vmul.f32 %v222_v20, %v1148_v0  ;;  %v225_v24 = vstv %s711_s19  ;;  %s1185_s30 = sld [smem:[#allocation2 + $0x10]] }
  0x41   : > { %v226_v27 = vmul.f32 %v225_v24, %v1151_v1  ;;  %v229_v28 = vstv %s712_s22  ;;  %s1192_s20 = sld [smem:[#allocation2 + $0x11]] }
  0x42   : > { %v230_v29 = vmul.f32 %v229_v28, %v1156_v2  ;;  %v233_v30 = vstv %s713_s23  ;;  %s719_s4 = sld [smem:[#allocation2 + $0x12]]  ;;  %v204_v34 = vadd.f32 %v203_v22, %v200_v21 }
  0x43   : > { %v227_v31 = vadd.f32 %v226_v27, %v223_v23  ;;  %v234_v32 = vmul.f32 %v233_v30, %v1161_v4  ;;  %v237_v33 = vstv %s714_s24  ;;  %s720_s5 = sld [smem:[#allocation2 + $0x13]] }
  0x44   : > { %v241_v36 = vstv %s1179_s28  ;;  %s721_s6 = sld [smem:[#allocation2 + $0x14]]  ;;  %v238_v40 = vmul.f32 %v237_v33, %v1170_v9  ;;  %v208_v44 = vadd.f32 %v207_v35, %v204_v34 }
  0x45   : > { %v231_v39 = vadd.f32 %v230_v29, %v227_v31  ;;  %v245_v41 = vstv %s1181_s29  ;;  %s722_s7 = sld [smem:[#allocation2 + $0x15]]  ;;  %v242_v43 = vmul.f32 %v241_v36, %v1176_v17 }
  0x46   : > { %s1204_s8 = sld [smem:[#allocation2 + $0x16]]  ;;  %v246_v46 = vmul.f32 %v245_v41, %v1188_v25  ;;  %v249_v49 = vstv %s1185_s30  ;;  %v212_v61 = vadd.f32 %v211_v45, %v208_v44 }
  0x47   : > { %v235_v42 = vadd.f32 %v234_v32, %v231_v39  ;;  %s1207_s15 = sld [smem:[#allocation2 + $0x17]]  ;;  %v250_v57 = vmul.f32 %v249_v49, %v1199_v37  ;;  %v253_v14 = vstv %s1192_s20 }
  0x48   : > { %v261_v47 = vstv %s719_s4  ;;  %s1211_s3 = sld [smem:[#allocation2 + $0x18]]  ;;  %v215_v13 = vadd.f32 %v214_v3, %v212_v61 }
  0x49   : > { %v239_v48 = vadd.f32 %v238_v40, %v235_v42  ;;  %v262_v50 = vmul.f32 %v261_v47, %v1148_v0  ;;  %v264_v51 = vstv %s720_s5  ;;  %s1215_s14 = sld [smem:[#allocation2 + $0x19]] }
  0x4a   : > { %v265_v52 = vmul.f32 %v264_v51, %v1151_v1  ;;  %v268_v53 = vstv %s721_s6  ;;  %s1218_s18 = sld [smem:[#allocation2 + $0x1a]]  ;;  %v216_v31 = vsub.f32 0.0, %v215_v13 }
  0x4b   : > { %v243_v54 = vadd.f32 %v242_v43, %v239_v48  ;;  %v269_v55 = vmul.f32 %v268_v53, %v1156_v2  ;;  %v272_v56 = vstv %s722_s7  ;;  %s728_s19 = sld [smem:[#allocation2 + $0x1b]] }
  0x4c   : > { %v266_v58 = vadd.f32 %v265_v52, %v262_v50  ;;  %v273_v59 = vmul.f32 %v272_v56, %v1161_v4  ;;  %v276_v60 = vstv %s1204_s8  ;;  %s729_s22 = sld [smem:[#allocation2 + $0x1c]]  ;;  %v217_v44 = vmul.f32 1.442695, %v216_v31 }
  0x4d   : > { %v247_v62 = vadd.f32 %v246_v46, %v243_v54  ;;  %v280_v63 = vstv %s1207_s15  ;;  %s730_s23 = sld [smem:[#allocation2 + $0x1d]]  ;;  %v277_v6 = vmul.f32 %v276_v60, %v1170_v9 }
  0x4e   : > { %v270_v5 = vadd.f32 %v269_v55, %v266_v58  ;;  %s731_s24 = sld [smem:[#allocation2 + $0x1e]]  ;;  %v284_v7 = vstv %s1211_s3  ;;  %v281_v11 = vmul.f32 %v280_v63, %v1176_v17  ;;  %855 = vpow2.f32 %v217_v44 }
  0x4f   : > { %s1228_s28 = sld [smem:[#allocation2 + $0x1f]]  ;;  %v251_v8 = vadd.f32 %v250_v57, %v247_v62  ;;  %v288_v12 = vstv %s1215_s14  ;;  %v285_v18 = vmul.f32 %v284_v7, %v1188_v25 }
  0x50   : > { %v274_v10 = vadd.f32 %v273_v59, %v270_v5  ;;  %s1232_s29 = sld [smem:[#allocation2 + $0x20]]  ;;  %v289_v21 = vmul.f32 %v288_v12, %v1199_v37  ;;  %v292_v35 = vstv %s1218_s18 }
  0x51   : > { %v300_v15 = vstv %s728_s19  ;;  %s1235_s30 = sld [smem:[#allocation2 + $0x21]]  ;;  %v254_v24 = vadd.f32 %v253_v14, %v251_v8 }
  0x52   : > { %v278_v16 = vadd.f32 %v277_v6, %v274_v10  ;;  %v301_v19 = vmul.f32 %v300_v15, %v1148_v0  ;;  %v303_v20 = vstv %s729_s22  ;;  %s1239_s17 = sld [smem:[#allocation2 + $0x22]] }
  0x53   : > { %v304_v22 = vmul.f32 %v303_v20, %v1151_v1  ;;  %v307_v23 = vstv %s730_s23  ;;  %s1243_s20 = sld [smem:[#allocation2 + $0x23]]  ;;  %v255_v39 = vsub.f32 0.0, %v254_v24 }
  0x54   : > { %v282_v26 = vadd.f32 %v281_v11, %v278_v16  ;;  %v308_v27 = vmul.f32 %v307_v23, %v1156_v2  ;;  %v311_v28 = vstv %s731_s24  ;;  %s737_s4 = sld [smem:[#allocation2 + $0x24]] }
  0x55   : > { %v305_v29 = vadd.f32 %v304_v22, %v301_v19  ;;  %v312_v30 = vmul.f32 %v311_v28, %v1161_v4  ;;  %s738_s5 = sld [smem:[#allocation2 + $0x25]]  ;;  %v315_v33 = vstv %s1228_s28  ;;  %v256_v52 = vmul.f32 1.442695, %v255_v39  ;;  %v856_v22 = vpop.eup %855 }
  0x56   : > { %v286_v32 = vadd.f32 %v285_v18, %v282_v26  ;;  %v319_v34 = vstv %s1232_s29  ;;  %s739_s6 = sld [smem:[#allocation2 + $0x26]]  ;;  %v316_v38 = vmul.f32 %v315_v33, %v1170_v9 }
  0x57   : > { %v309_v36 = vadd.f32 %v308_v27, %v305_v29  ;;  %s740_s7 = sld [smem:[#allocation2 + $0x27]]  ;;  %v323_v41 = vstv %s1235_s30  ;;  %v320_v43 = vmul.f32 %v319_v34, %v1176_v17  ;;  %857 = vpow2.f32 %v256_v52 }
  0x58   : > { %v290_v40 = vadd.f32 %v289_v21, %v286_v32  ;;  %s1252_s8 = sld [smem:[#allocation2 + $0x28]]  ;;  %v327_v46 = vstv %s1239_s17  ;;  %v324_v49 = vmul.f32 %v323_v41, %v1188_v25  ;;  %v219_v34 = vadd.f32 1.0, %v856_v22 }
  0x59   : > { %v313_v42 = vadd.f32 %v312_v30, %v309_v36  ;;  %s1255_s15 = sld [smem:[#allocation2 + $0x29]]  ;;  %v328_v57 = vmul.f32 %v327_v46, %v1199_v37  ;;  %v331_v6 = vstv %s1243_s20 }
  0x5a   : > { %v293_v45 = vadd.f32 %v292_v35, %v290_v40  ;;  %v339_v47 = vstv %s737_s4  ;;  %s1258_s3 = sld [smem:[#allocation2 + $0x2a]] }
  0x5b   : > { %v317_v48 = vadd.f32 %v316_v38, %v313_v42  ;;  %v340_v50 = vmul.f32 %v339_v47, %v1148_v0  ;;  %v342_v51 = vstv %s738_s5  ;;  %s1262_s14 = sld [smem:[#allocation2 + $0x2b]] }
  0x5c   : > { %v294_v53 = vsub.f32 0.0, %v293_v45  ;;  %v343_v54 = vmul.f32 %v342_v51, %v1151_v1  ;;  %v346_v55 = vstv %s739_s6  ;;  %s1265_s18 = sld [smem:[#allocation2 + $0x2c]] }
  0x5d   : > { %v321_v56 = vadd.f32 %v320_v43, %v317_v48  ;;  %v347_v58 = vmul.f32 %v346_v55, %v1156_v2  ;;  %v350_v59 = vstv %s740_s7  ;;  %s746_s19 = sld [smem:[#allocation2 + $0x2d]]  ;;  %v858_v27 = vpop.eup %857 }
  0x5e   : > { %v344_v60 = vadd.f32 %v343_v54, %v340_v50  ;;  %v351_v61 = vmul.f32 %v350_v59, %v1161_v4  ;;  %v354_v62 = vstv %s1252_s8  ;;  %s747_s22 = sld [smem:[#allocation2 + $0x2e]]  ;;  %v295_v63 = vmul.f32 1.442695, %v294_v53 }
  0x5f   : > { %v325_v3 = vadd.f32 %v324_v49, %v321_v56  ;;  %v358_v5 = vstv %s1255_s15  ;;  %s748_s23 = sld [smem:[#allocation2 + $0x2f]]  ;;  %v355_v8 = vmul.f32 %v354_v62, %v1170_v9  ;;  %v258_v39 = vadd.f32 1.0, %v858_v27 }
  0x60   : > { %v348_v7 = vadd.f32 %v347_v58, %v344_v60  ;;  %s749_s24 = sld [smem:[#allocation2 + $0x30]]  ;;  %v362_v11 = vstv %s1258_s3  ;;  %v359_v13 = vmul.f32 %v358_v5, %v1176_v17  ;;  %859 = vpow2.f32 %v295_v63 }
  0x61   : > { %v329_v10 = vadd.f32 %v328_v57, %v325_v3  ;;  %s1275_s28 = sld [smem:[#allocation2 + $0x31]]  ;;  %v366_v15 = vstv %s1262_s14  ;;  %v363_v19 = vmul.f32 %v362_v11, %v1188_v25 }
  0x62   : > { %v352_v12 = vadd.f32 %v351_v61, %v348_v7  ;;  %s1278_s29 = sld [smem:[#allocation2 + $0x32]]  ;;  %v367_v29 = vmul.f32 %v366_v15, %v1199_v37  ;;  %v370_v40 = vstv %s1265_s18 }
  0x63   : > { %v332_v14 = vadd.f32 %v331_v6, %v329_v10  ;;  %v378_v16 = vstv %s746_s19  ;;  %s1281_s30 = sld [smem:[#allocation2 + $0x33]] }
  0x64   : > { %v356_v18 = vadd.f32 %v355_v8, %v352_v12  ;;  %v379_v20 = vmul.f32 %v378_v16, %v1148_v0  ;;  %v381_v21 = vstv %s747_s22  ;;  %s1285_s17 = sld [smem:[#allocation2 + $0x34]] }
  0x65   : > { %v333_v23 = vsub.f32 0.0, %v332_v14  ;;  %v382_v24 = vmul.f32 %v381_v21, %v1151_v1  ;;  %v385_v26 = vstv %s748_s23  ;;  %s1295_s20 = sld [smem:[#allocation2 + $0x35]] }
  0x66   : > { %v360_v28 = vadd.f32 %v359_v13, %v356_v18  ;;  %v386_v30 = vmul.f32 %v385_v26, %v1156_v2  ;;  %v389_v31 = vstv %s749_s24  ;;  %v860_v1 = vpop.eup %859  ;;  %s1298_s4 = sld [smem:[#allocation2 + $0x36]] }
  0x67   : > { %v334_v0 = vmul.f32 1.442695, %v333_v23  ;;  %v383_v32 = vadd.f32 %v382_v24, %v379_v20  ;;  %v390_v33 = vmul.f32 %v389_v31, %v1161_v4  ;;  %v393_v36 = vstv %s1275_s28  ;;  %s1301_s5 = sld [smem:[#allocation2 + $0x37]] }
  0x68   : > { %v364_v35 = vadd.f32 %v363_v19, %v360_v28  ;;  %v397_v38 = vstv %s1278_s29  ;;  %v394_v42 = vmul.f32 %v393_v36, %v1170_v9  ;;  %v297_v47 = vadd.f32 1.0, %v860_v1  ;;  %s1305_s6 = sld [smem:[#allocation2 + $0x3d]] }
  0x69   : > { %v387_v41 = vadd.f32 %v386_v30, %v383_v32  ;;  %861 = vpow2.f32 %v334_v0  ;;  %v401_v43 = vstv %s1281_s30  ;;  %v398_v4 = vmul.f32 %v397_v38, %v1176_v17  ;;  %s1307_s7 = sld [smem:[#allocation2 + $0x3e]] }
  0x6a   : > { %v368_v2 = vadd.f32 %v367_v29, %v364_v35  ;;  %863 = vrcp.f32 %v219_v34  ;;  %v405_v46 = vstv %s1285_s17  ;;  %v402_v9 = vmul.f32 %v401_v43, %v1188_v25  ;;  %s1310_s8 = sld [smem:[#allocation2 + $0x38]] }
  0x6b   : > { %v391_v44 = vadd.f32 %v390_v33, %v387_v41  ;;  %865 = vrcp.f32 %v258_v39  ;;  %v406_v17 = vmul.f32 %v405_v46, %v1199_v37  ;;  %s1312_s15 = sld [smem:[#allocation2 + $0x39]]  ;;  %v409_v55 = vstv %s1295_s20 }
  0x6c   : > { %v371_v45 = vadd.f32 %v370_v40, %v368_v2  ;;  %867 = vrcp.f32 %v297_v47  ;;  %s1314_s3 = sld [smem:[#allocation2 + $0x3f]]  ;;  %v417_v57 = vstv %s1298_s4 }
  0x6d   : > { %v395_v48 = vadd.f32 %v394_v42, %v391_v44  ;;  %s1319_s14 = sld [smem:[#allocation2 + $0x3a]]  ;;  %v420_v58 = vstv %s1301_s5 }
  0x6e   : > { %v372_v49 = vsub.f32 0.0, %v371_v45  ;;  %s1325_s18 = sld [smem:[#allocation2 + $0x40]]  ;;  %v448_v60 = vstv %s1305_s6 }
  0x6f   : > { %v399_v50 = vadd.f32 %v398_v4, %v395_v48  ;;  %v862_v51 = vpop.eup %861  ;;  %s769_s19 = sld [smem:[#allocation2 + $0x44]]  ;;  %v451_v61 = vstv %s1307_s7 }
  0x70   : > { %v373_v52 = vmul.f32 1.442695, %v372_v49  ;;  %v336_v25 = vadd.f32 1.0, %v862_v51  ;;  %v1316_v54 = vpop.eup %863  ;;  %s770_s22 = sld [smem:[#allocation2 + $0x45]]  ;;  %v424_v6 = vstv %s1310_s8 }
  0x71   : > { %v403_v53 = vadd.f32 %v402_v9, %v399_v50  ;;  %v1321_v37 = vpop.eup %865  ;;  %v418_v62 = vmul.f32 %v1316_v54, %v417_v57  ;;  %s1331_s23 = sld [smem:[#allocation2 + $0x46]]  ;;  %v449_v8 = vmul.f32 %v1316_v54, %v448_v60  ;;  %v428_v19 = vstv %s1312_s15 }
  0x72   : > { %869 = vpow2.f32 %v373_v52  ;;  %v421_v63 = vmul.f32 %v1321_v37, %v420_v58  ;;  %v1333_v3 = vpop.eup %867  ;;  %s1336_s24 = sld [smem:[#allocation2 + $0x47]]  ;;  %v452_v10 = vmul.f32 %v1321_v37, %v451_v61  ;;  %v455_v13 = vstv %s1314_s3 }
  0x73   : > { %v407_v56 = vadd.f32 %v406_v17, %v403_v53  ;;  %871 = vrcp.f32 %v336_v25  ;;  %s1338_s28 = sld [smem:[#allocation2 + $0x3b]]  ;;  %v425_v15 = vmul.f32 %v1333_v3, %v424_v6  ;;  %v456_v23 = vmul.f32 %v1333_v3, %v455_v13 }
  0x74   : > { %s1343_s29 = sld [smem:[#allocation2 + $0x41]]  ;;  %v422_v14 = vadd.f32 %v421_v63, %v418_v62  ;;  %v453_v22 = vadd.f32 %v452_v10, %v449_v8  ;;  %v459_v26 = vstv %s1325_s18  ;;  %v432_v35 = vstv %s1319_s14 }
  0x75   : > { %v410_v59 = vadd.f32 %v409_v55, %v407_v56  ;;  %v479_v16 = vstv %s769_s19  ;;  %s1346_s30 = sld [smem:[#allocation2 + $0x48]] }
  0x76   : > { %v480_v20 = vmul.f32 %v1316_v54, %v479_v16  ;;  %v482_v21 = vstv %s770_s22  ;;  %s1350_s17 = sld [smem:[#allocation2 + $0x4b]]  ;;  %v426_v28 = vadd.f32 %v425_v15, %v422_v14  ;;  %v457_v32 = vadd.f32 %v456_v23, %v453_v22 }
  0x77   : > { %v411_v5 = vsub.f32 0.0, %v410_v59  ;;  %v483_v24 = vmul.f32 %v1321_v37, %v482_v21  ;;  %s1354_s20 = sld [smem:[#allocation2 + $0x4c]]  ;;  %v486_v27 = vstv %s1331_s23 }
  0x78   : > { %v870_v7 = vpop.eup %869  ;;  %s1358_s4 = sld [smem:[#allocation2 + $0x4d]]  ;;  %v487_v31 = vmul.f32 %v1333_v3, %v486_v27  ;;  %v490_v0 = vstv %s1336_s24 }
  0x79   : > { %v375_v11 = vadd.f32 1.0, %v870_v7  ;;  %v412_v12 = vmul.f32 1.442695, %v411_v5  ;;  %v872_v18 = vpop.eup %871  ;;  %v484_v30 = vadd.f32 %v483_v24, %v480_v20  ;;  %s1361_s5 = sld [smem:[#allocation2 + $0x4e]] }
  0x7a   : > { %v429_v29 = vmul.f32 %v872_v18, %v428_v19  ;;  %s1364_s6 = sld [smem:[#allocation2 + $0x4f]]  ;;  %v460_v33 = vmul.f32 %v872_v18, %v459_v26  ;;  %v463_v36 = vstv %s1343_s29  ;;  %v491_v41 = vmul.f32 %v872_v18, %v490_v0 }
  0x7b   : > { %873 = vrcp.f32 %v375_v11  ;;  %s1366_s7 = sld [smem:[#allocation2 + $0x42]]  ;;  %v488_v40 = vadd.f32 %v487_v31, %v484_v30  ;;  %v494_v42 = vstv %s1346_s30 }
  0x7c   : > { %875 = vpow2.f32 %v412_v12  ;;  %s1370_s8 = sld [smem:[#allocation2 + $0x49]]  ;;  %v510_v38 = vstv %s1350_s17  ;;  %v430_v39 = vadd.f32 %v429_v29, %v426_v28  ;;  %v461_v46 = vadd.f32 %v460_v33, %v457_v32 }
  0x7d   : > { %s1374_s15 = sld [smem:[#allocation2 + $0x50]]  ;;  %v511_v43 = vmul.f32 %v1316_v54, %v510_v38  ;;  %v513_v44 = vstv %s1354_s20  ;;  %v492_v17 = vadd.f32 %v491_v41, %v488_v40 }
  0x7e   : > { %s1376_s3 = sld [smem:[#allocation2 + $0x3c]]  ;;  %v517_v4 = vstv %s1358_s4  ;;  %v514_v48 = vmul.f32 %v1321_v37, %v513_v44  ;;  %v436_v37 = vstv %s1338_s28 }
  0x7f   : > { %s1381_s14 = sld [smem:[#allocation2 + $0x43]]  ;;  %v518_v9 = vmul.f32 %v1333_v3, %v517_v4  ;;  %v521_v49 = vstv %s1361_s5 }
  0x80   : > { %s1384_s18 = sld [smem:[#allocation2 + $0x4a]]  ;;  %v525_v50 = vstv %s1364_s6  ;;  %v515_v52 = vadd.f32 %v514_v48, %v511_v43  ;;  %v522_v25 = vmul.f32 %v872_v18, %v521_v49 }
  0x81   : > { %v874_v34 = vpop.eup %873  ;;  %s782_s19 = sld [smem:[#allocation2 + $0x51]]  ;;  %v467_v56 = vstv %s1366_s7 }
  0x82   : > { %v876_v1 = vpop.eup %875  ;;  %v433_v45 = vmul.f32 %v874_v34, %v432_v35  ;;  %v464_v47 = vmul.f32 %v874_v34, %v463_v36  ;;  %v495_v51 = vmul.f32 %v874_v34, %v494_v42  ;;  %v519_v53 = vadd.f32 %v518_v9, %v515_v52  ;;  %s1396_s22 = sld [smem:[#allocation2 + $0x52]] }
  0x83   : > { %v414_v2 = vadd.f32 1.0, %v876_v1  ;;  %v526_v54 = vmul.f32 %v874_v34, %v525_v50  ;;  %v498_v57 = vstv %s1370_s8  ;;  %v529_v61 = vstv %s1374_s15  ;;  %s1398_s23 = sld [smem:[#allocation2 + $0x53]] }
  0x84   : > { %v434_v55 = vadd.f32 %v433_v45, %v430_v39  ;;  %v465_v58 = vadd.f32 %v464_v47, %v461_v46  ;;  %v496_v59 = vadd.f32 %v495_v51, %v492_v17  ;;  %v523_v60 = vadd.f32 %v522_v25, %v519_v53  ;;  %s1400_s24 = sld [smem:[#allocation2 + $0x54]] }
  0x85   : > { %877 = vrcp.f32 %v414_v2  ;;  %v440_v7 = vstv %s1376_s3  ;;  %v471_v8 = vstv %s1381_s14  ;;  %s1402_s28 = sld [smem:[#allocation2 + $0x55]]  ;;  %s611_s14 = scalar_lea.hbm %s1447_s2, %s1061_s13 }
  0x86   : > { %v527_v6 = vadd.f32 %v526_v54, %v523_v60  ;;  %v502_v10 = vstv %s1384_s18  ;;  %s788_s29 = sld [smem:[#allocation2 + $0x57]]  ;;  %s173_s18 = scalar_lea.vmem [#allocation7], %s1137_s27 }
  0x87   : > { %v533_v15 = vstv %s782_s19  ;;  %s789_s30 = sld [smem:[#allocation2 + $0x58]]  ;;  %s613_s19 = sshll.u32 %s173_s18, 4  ;;  %s614_s19 = int_to_ptr.vmem [resolvable:$true] %s613_s19 }
  0x88   : > { %s790_s17 = sld [smem:[#allocation2 + $0x59]]  ;;  %v541_v1 = vstv %s1396_s22  ;;  %s615_s22 = sshll.u32 %s611_s14, 4  ;;  %s616_s22 = int_to_ptr.hbm [resolvable:$true] %s615_s22 }
  0x89   : > { %s1404_s20 = sld [smem:[#allocation2 + $0x5a]]  ;;  %v544_v40 = vstv %s1398_s23  ;;  %s603_s23 = scalar_lea.sflag [#allocation4], %s1137_s27 }
  0x8a   : > { %s787_s4 = sld [smem:[#allocation2 + $0x56]]  ;;  %v548_v2 = vstv %s1400_s24  ;;  %s966_s24 = sshra.s32 %s616_s22, 4  ;;  %s967_s24 = int_to_ptr.hbm [resolvable:$true] %s966_s24 }
  0x8b   : > { %v878_v62 = vpop.eup %877  ;;  %s792_s5 = sld [smem:[#allocation2 + $0x5b]]  ;;  %v552_v45 = vstv %s1402_s28  ;;  %s968_s28 = scalar_lea.hbm %s967_s24, 1 }
  0x8c   : > { %v437_v63 = vmul.f32 %v878_v62, %v436_v37  ;;  %v468_v3 = vmul.f32 %v878_v62, %v467_v56  ;;  %v499_v5 = vmul.f32 %v878_v62, %v498_v57  ;;  %v530_v11 = vmul.f32 %v878_v62, %v529_v61  ;;  %s793_s6 = sld [smem:[#allocation2 + $0x5c]]  ;;  %p969_p1 = scmp.ne.s32.totalorder %s967_s24, %s968_s28 }
  0x8d   : > { %v564_v39 = vstv %s788_s29  ;;  %v567_v41 = vstv %s789_s30  ;;  %s794_s7 = sld [smem:[#allocation2 + $0x5d]]  ;;  %s972_s13 = scalar_lea.hbm %s1447_s2, 2 }
  0x8e   : > { %v438_v12 = vadd.f32 %v437_v63, %v434_v55  ;;  %v469_v13 = vadd.f32 %v468_v3, %v465_v58  ;;  %v500_v14 = vadd.f32 %v499_v5, %v496_v59  ;;  %v531_v16 = vadd.f32 %v530_v11, %v527_v6  ;;  %s795_s8 = sld [smem:[#allocation2 + $0x5e]]  ;;  %p970_p4 = pnand %p969_p1, %p1106_p3 }
  0x8f   : > { %v571_v43 = vstv %s790_s17  ;;  %v575_v47 = vstv %s1404_s20  ;;  %p973_p9 = scmp.lt.s32.totalorder %s967_s24, %s1447_s2  ;;  %p974_p10 = scmp.lt.s32.totalorder %s972_s13, %s968_s28 }
  0x90   : > { %v441_v18 = vadd.f32 %v440_v7, %v438_v12  ;;  %v472_v19 = vadd.f32 %v471_v8, %v469_v13  ;;  %v503_v20 = vadd.f32 %v502_v10, %v500_v14  ;;  %v534_v21 = vadd.f32 %v533_v15, %v531_v16  ;;  %p971_p8 = pneg %p970_p4 }
  0x91   : > { %v556_v56 = vstv %s787_s4  ;;  %v579_v57 = vstv %s792_s5  ;;  %p975_p2 = por %p974_p10, %p973_p9 }
  0x92   : > { %v442_v22 = vsub.f32 0.0, %v441_v18  ;;  %v473_v23 = vsub.f32 0.0, %v472_v19  ;;  %v504_v24 = vsub.f32 0.0, %v503_v20  ;;  %v535_v26 = vsub.f32 0.0, %v534_v21 }
  0x93   : > { %v587_v11 = vstv %s793_s6  ;;  %v590_v12 = vstv %s794_s7  ;;  %p976_p11 = pnand %p975_p2, %p971_p8 }
  0x94   : > { %v443_v27 = vmul.f32 1.442695, %v442_v22  ;;  %v474_v28 = vmul.f32 1.442695, %v473_v23  ;;  %v505_v29 = vmul.f32 1.442695, %v504_v24  ;;  %v594_v18 = vstv %s795_s8 }
  0x95   : > { %v536_v30 = vmul.f32 1.442695, %v535_v26 }
  0x96   : > { %879 = vpow2.f32 %v443_v27 }
  0x97   : > { %881 = vpow2.f32 %v474_v28 }
  0x98   : > { %883 = vpow2.f32 %v505_v29 }
  0x99   : > { %885 = vpow2.f32 %v536_v30 }
  0x9c   : > { %v880_v31 = vpop.eup %879 }
  0x9d   : > { %v882_v0 = vpop.eup %881  ;;  %v445_v32 = vadd.f32 1.0, %v880_v31 }
  0x9e   : > { %v884_v33 = vpop.eup %883  ;;  %v476_v34 = vadd.f32 1.0, %v882_v0 }
  0x9f   : > { %v886_v35 = vpop.eup %885  ;;  %887 = vrcp.f32 %v445_v32  ;;  %v507_v36 = vadd.f32 1.0, %v884_v33 }
  0xa0   : > { %889 = vrcp.f32 %v476_v34  ;;  %v538_v38 = vadd.f32 1.0, %v886_v35 }
  0xa1   : > { %891 = vrcp.f32 %v507_v36 }
  0xa2   : > { %893 = vrcp.f32 %v538_v38 }
  0xa5   : > { %v888_v42 = vpop.eup %887 }
  0xa6   : > { %v890_v44 = vpop.eup %889  ;;  %v542_v4 = vmul.f32 %v888_v42, %v541_v1  ;;  %v565_v46 = vmul.f32 %v888_v42, %v564_v39 }
  0xa7   : > { %v892_v48 = vpop.eup %891  ;;  %v545_v9 = vmul.f32 %v890_v44, %v544_v40  ;;  %v568_v49 = vmul.f32 %v890_v44, %v567_v41 }
  0xa8   : > { %v894_v50 = vpop.eup %893  ;;  %v549_v17 = vmul.f32 %v892_v48, %v548_v2  ;;  %v572_v51 = vmul.f32 %v892_v48, %v571_v43 }
  0xa9   : > { %v546_v52 = vadd.f32 %v545_v9, %v542_v4  ;;  %v553_v25 = vmul.f32 %v894_v50, %v552_v45  ;;  %v569_v53 = vadd.f32 %v568_v49, %v565_v46  ;;  %v576_v54 = vmul.f32 %v894_v50, %v575_v47 }
  0xab   : > { %v550_v55 = vadd.f32 %v549_v17, %v546_v52  ;;  %v573_v37 = vadd.f32 %v572_v51, %v569_v53 }
  0xad   : > { %v554_v58 = vadd.f32 %v553_v25, %v550_v55  ;;  %v577_v59 = vadd.f32 %v576_v54, %v573_v37 }
  0xaf   : > { %v557_v60 = vadd.f32 %v556_v56, %v554_v58  ;;  %v580_v61 = vadd.f32 %v579_v57, %v577_v59 }
  0xb1   : > { %v558_v62 = vsub.f32 0.0, %v557_v60  ;;  %v581_v63 = vsub.f32 0.0, %v580_v61 }
  0xb3   : > { %v559_v3 = vmul.f32 1.442695, %v558_v62  ;;  %v582_v5 = vmul.f32 1.442695, %v581_v63 }
  0xb5   : > { %895 = vpow2.f32 %v559_v3 }
  0xb6   : > { %897 = vpow2.f32 %v582_v5 }
  0xbb   : > { %v896_v6 = vpop.eup %895 }
  0xbc   : > { %v898_v7 = vpop.eup %897  ;;  %v561_v8 = vadd.f32 1.0, %v896_v6 }
  0xbd   : > { %v584_v10 = vadd.f32 1.0, %v898_v7 }
  0xbe   : > { %899 = vrcp.f32 %v561_v8 }
  0xbf   : > { %901 = vrcp.f32 %v584_v10 }
  0xc4   : > { %v900_v13 = vpop.eup %899 }
  0xc5   : > { %v902_v14 = vpop.eup %901  ;;  %v588_v15 = vmul.f32 %v900_v13, %v587_v11 }
  0xc6   : > { %v591_v16 = vmul.f32 %v902_v14, %v590_v12 }
  0xc8   : > { %v592_v19 = vadd.f32 %v591_v16, %v588_v15 }
  0xca   : > { %v595_v20 = vadd.f32 %v594_v18, %v592_v19 }
  0xcc   : > { %v596_v21 = vsub.f32 0.0, %v595_v20 }
  0xce   : > { %v597_v22 = vmul.f32 1.442695, %v596_v21 }
  0xd0   : > { %903 = vpow2.f32 %v597_v22 }
  0xd6   : > { %v904_v23 = vpop.eup %903 }
  0xd7   : > { %v599_v24 = vadd.f32 1.0, %v904_v23 }
  0xd9   : > { %905 = vrcp.f32 %v599_v24 }
  0xdf   : > { %v906_v26 = vpop.eup %905 }
  0xe0   : > { %601 = vst [vmem:[%s173_s18] sm:$0x1] %v906_v26 }
  0xe1   : > { %979 = shalt.err (!%p976_p11)
}
  0xe2   : > { %804 = dma.vmem_to_hbm [thread:$0]  (%p1106_p3), %s614_s19, 16, %s616_s22, %s603_s23  }
  0xe3 PF: > { %s627_s27 = sand.u32 1, %s1010_s9   ;;  %p1453_p12 = scmp.ge.s32.totalorder %s1022_s12, 2 }
  0xe4   : > { %s628_s4 = scalar_lea.sflag [#allocation4], %s627_s27 }
  0xe5   : > { %p815_p13 = pnand %p1453_p12, %p1075_p6 }
  0xe7   : > { %p816_p0 = pneg %p815_p13 }
  0xe9   : > { %1005 = dma.done.wait (%p816_p0), %s628_s4, 16  }
  0xea   : > { %1007 = vsyncadd (%p816_p0), %s628_s4, 4294967280  ;;  %p16_p5 = scmp.ge.s32.totalorder %s1091_s21, 4   ;;  %s1454_s9 = smov %s1014_s10 }
  0xeb   : > { %s1455_s10 = smov %s1018_s11  ;;  %s1456_s11 = smov %s1101_s25 }
  0xec   : > { %s1457_s12 = smov %s1091_s21  ;;  %18 = sbr.rel (!%p16_p5) target bundleno = 6 (0x6), region = 78 }
  0xf1   :  { %633 = vsyncpa [#allocation3], 1 }
  0xf2   :  { %635 = vsyncpa [#allocation3 + $0x1], 1 }
  0xf3   :  { %636 = vsyncpa [#allocation4], 1 }
  0xf4   :  { %638 = vsyncpa [#allocation4 + $0x1], 1 }
  0xf5   :  { %639 = vsyncpa [#allocation5], 1 }
  0xf6   :  { %641 = vsyncpa [#allocation5 + $0x1], 1 }

</bundles_post_ra>
